<compile_context>
chip_gen: v7x
topology: tpu7x:2x2x1
jax: 0.10.0
libtpu: 0.0.40
codegen_flags: <defaults>
</compile_context>

<pallas_src>
import functools

import jax
import jax.numpy as jnp
from jax.experimental import pallas as pl
from jax.experimental.pallas import tpu as pltpu

INPUT_SIZE = 784
HIDDEN_SIZE = 32
NUM_CLASSES = 10
LEAKY_SLOPE = 0.01            # nn.LeakyReLU default negative_slope
DEFAULT_BATCH_TILE = 2048     # rows per grid step; multiple of 8 (sublane) and 128 (MXU M)
MIN_GRID_STEPS = 4            # target grid steps for big batches (keeps v7x's 2 TCs busy)


def _round_up(x, m):
    return ((x + m - 1) // m) * m


def mlp_kernel(x_ref, w1_ref, b1_ref, w2_ref, b2_ref,
               w3_ref, b3_ref, w4_ref, b4_ref, o_ref):
    # Whole forward pass fused in VMEM: 4 MXU matmuls + VPU/EUP activations.
    cdt = w1_ref.dtype                      # matmul-operand compute dtype (bf16 or f32)
    x = x_ref[...].astype(cdt)              # in-kernel cast: VPU work hidden under the DMA

    h = jnp.dot(x, w1_ref[...], preferred_element_type=jnp.float32) + b1_ref[...]
    h = jnp.where(h > 0, h, LEAKY_SLOPE * h)                     # LeakyReLU (f32)

    h = jnp.dot(h.astype(cdt), w2_ref[...], preferred_element_type=jnp.float32) + b2_ref[...]
    h = jnp.maximum(h, 0.0)                                      # ReLU (f32)

    h = jnp.dot(h.astype(cdt), w3_ref[...], preferred_element_type=jnp.float32) + b3_ref[...]
    h = jnp.tanh(h)                                              # Tanh (EUP, f32)

    o_ref[...] = (jnp.dot(h.astype(cdt), w4_ref[...], preferred_element_type=jnp.float32)
                  + b4_ref[...]).astype(o_ref.dtype)


def prepare_params(params, compute_dtype=jnp.bfloat16):
    """One-time prep (do NOT redo per call): transpose PyTorch-style (out, in) weights to
    (in, out) and cast to compute_dtype; reshape biases to (1, out) in f32."""
    prepared = []
    for w, b in params:
        prepared.append(jnp.asarray(w.T, dtype=compute_dtype))
        prepared.append(jnp.asarray(b, dtype=jnp.float32).reshape(1, -1))
    return tuple(prepared)


def _choose_tb(B, tb):
    """Collapse tiny batches to one step; cap big batches so the grid has >= MIN_GRID_STEPS
    steps (otherwise one-step grids leave the second v7x TensorCore idle)."""
    tb = max(8, min(tb, _round_up(B, 8)))
    if B >= MIN_GRID_STEPS * 256:
        tb = min(tb, max(256, _round_up(-(-B // MIN_GRID_STEPS), 256)))
    return tb


def _x_block_spec(tb, depth):
    idx_map = lambda i: (i, 0)
    if depth > 2:
        try:
            return pl.BlockSpec((tb, INPUT_SIZE), idx_map, pipeline_mode=pl.Buffered(depth))
        except Exception:
            pass  # older JAX without pipeline_mode / pl.Buffered: default double-buffering
    return pl.BlockSpec((tb, INPUT_SIZE), idx_map)


def _vmem_limit_bytes(tb, x_itemsize, prepared, depth):
    """Explicit scoped-VMEM budget: x tiles (depth-buffered) + output tiles (2 buffers)
    + lane-padded weights + headroom. Clamped under v7x's 64 MiB physical VMEM."""
    lane = 128
    x_tile = tb * _round_up(INPUT_SIZE, lane) * x_itemsize
    out_tile = tb * lane * 4                       # (tb, 10) lane-padded, f32 upper bound
    w_bytes = 0
    for a in prepared:
        rows = 1
        for d in a.shape[:-1]:
            rows *= int(d)
        w_bytes += _round_up(rows, 8) * _round_up(int(a.shape[-1]), lane) * a.dtype.itemsize
    need = x_tile * depth + out_tile * 2 + 2 * w_bytes + (2 << 20)
    return int(min(max(need * 5 // 4, 16 << 20), 48 << 20))


@functools.partial(jax.jit, static_argnames=("tb", "out_dtype"))
def mlp_forward(x, prepared, tb=DEFAULT_BATCH_TILE, out_dtype=jnp.float32):
    """x: [B, ...] (flattened to [B, 784] like x.view(B, -1)). Returns [B, 10] out_dtype."""
    B = x.shape[0]
    x2d = x.reshape(B, -1)                 # layout-preserving reshape; NO dtype cast here
    assert x2d.shape[1] == INPUT_SIZE

    tb = _choose_tb(B, tb)
    num_steps = pl.cdiv(B, tb)
    depth = 3 if num_steps >= 3 else 2     # 3-deep x pipeline only when it can help

    x_spec = _x_block_spec(tb, depth)
    out_spec = pl.BlockSpec((tb, NUM_CLASSES), lambda i: (i, 0))
    # Weights/biases: constant block index -> kept VMEM-resident across all grid steps.
    const_spec = lambda a: pl.BlockSpec(a.shape, lambda i: (0, 0))
    in_specs = [x_spec] + [const_spec(a) for a in prepared]

    x_itemsize = jnp.dtype(x2d.dtype).itemsize
    out_itemsize = jnp.dtype(out_dtype).itemsize
    flops = 2 * B * (INPUT_SIZE * HIDDEN_SIZE + 2 * HIDDEN_SIZE * HIDDEN_SIZE
                     + HIDDEN_SIZE * NUM_CLASSES)
    bytes_accessed = (B * (INPUT_SIZE * x_itemsize + NUM_CLASSES * out_itemsize)
                      + sum(a.size * a.dtype.itemsize for a in prepared))
    cost = pl.CostEstimate(flops=flops, transcendentals=B * HIDDEN_SIZE,
                           bytes_accessed=bytes_accessed)

    return pl.pallas_call(
        mlp_kernel,
        out_shape=jax.ShapeDtypeStruct((B, NUM_CLASSES), out_dtype),
        grid=(num_steps,),
        in_specs=in_specs,
        out_specs=out_spec,
        compiler_params=pltpu.CompilerParams(
            dimension_semantics=("parallel",),   # shard batch axis across v7x's 2 TCs
            vmem_limit_bytes=_vmem_limit_bytes(tb, x_itemsize, prepared, depth)),
        cost_estimate=cost,
    )(x2d, *prepared)


def init_params(key):
    """Deterministic init matching PyTorch Linear shapes: weight (out, in), bias (out,)."""
    dims = [(INPUT_SIZE, HIDDEN_SIZE), (HIDDEN_SIZE, HIDDEN_SIZE),
            (HIDDEN_SIZE, HIDDEN_SIZE), (HIDDEN_SIZE, NUM_CLASSES)]
    params = []
    for (fan_in, fan_out) in dims:
        key, kw, kb = jax.random.split(key, 3)
        bound = 1.0 / jnp.sqrt(fan_in)
        w = jax.random.uniform(kw, (fan_out, fan_in), jnp.float32, -bound, bound)
        b = jax.random.uniform(kb, (fan_out,), jnp.float32, -bound, bound)
        params.append((w, b))
    return params


def reference_forward(x, params, compute_dtype=jnp.float32):
    """Pure-JAX reference mirroring the kernel's dtype policy (matmul operands cast,
    f32 accumulation, f32 elementwise)."""
    B = x.shape[0]
    h = x.reshape(B, -1).astype(jnp.float32)
    (w1, b1), (w2, b2), (w3, b3), (w4, b4) = params

    def lin(h, w, b):
        return (jnp.dot(h.astype(compute_dtype), w.T.astype(compute_dtype),
                        preferred_element_type=jnp.float32) + b)

    h = lin(h, w1, b1)
    h = jnp.where(h > 0, h, LEAKY_SLOPE * h)
    h = lin(h, w2, b2)
    h = jnp.maximum(h, 0.0)
    h = lin(h, w3, b3)
    h = jnp.tanh(h)
    return lin(h, w4, b4)


if __name__ == "__main__":
    key = jax.random.PRNGKey(0)
    kx, kp = jax.random.split(key)
    params = init_params(kp)

    # MNIST-like input: batch=8, NCHW [8, 1, 28, 28] -> flattened to 784 in forward.
    x = jax.random.normal(kx, (8, 1, 28, 28), dtype=jnp.float32)

    # 1) f32 compute path (exact check vs reference).
    prep_f32 = prepare_params(params, jnp.float32)
    out_f32 = jax.block_until_ready(mlp_forward(x, prep_f32))
    ref_f32 = reference_forward(x, params, jnp.float32)
    assert out_f32.shape == (8, NUM_CLASSES)
    assert jnp.allclose(out_f32, ref_f32, atol=1e-4, rtol=1e-4), "f32 mismatch vs reference"

    # 2) bf16 matmul operands, f32 x streamed + cast in-kernel (the performance path).
    prep_bf16 = prepare_params(params, jnp.bfloat16)
    out_bf16 = jax.block_until_ready(mlp_forward(x, prep_bf16))
    ref_bf16 = reference_forward(x, params, jnp.bfloat16)
    assert out_bf16.shape == (8, NUM_CLASSES)
    assert jnp.allclose(out_bf16, ref_bf16, atol=1e-2, rtol=1e-2), "bf16 mismatch vs reference"

    # 3) Multi-step batch grid with a partial last block (144 rows, tile=64 -> 3 steps,
    #    exercises the 3-deep x pipeline).
    xb = jax.random.normal(jax.random.PRNGKey(1), (144, 1, 28, 28), dtype=jnp.float32)
    out_big = jax.block_until_ready(mlp_forward(xb, prep_f32, tb=64))
    ref_big = reference_forward(xb, params, jnp.float32)
    assert out_big.shape == (144, NUM_CLASSES)
    assert jnp.allclose(out_big, ref_big, atol=1e-4, rtol=1e-4), "tiled-grid mismatch vs reference"

    # 4) bf16 logits output option (halves the lane-padded writeback).
    out_bf16_logits = jax.block_until_ready(mlp_forward(x, prep_bf16, out_dtype=jnp.bfloat16))
    assert out_bf16_logits.shape == (8, NUM_CLASSES) and out_bf16_logits.dtype == jnp.bfloat16
    assert jnp.allclose(out_bf16_logits.astype(jnp.float32), ref_bf16, atol=5e-2, rtol=5e-2), \
        "bf16-logits mismatch vs reference"

    print("KERNEL_OK")
</pallas_src>

<mosaic_0001>
module attributes {stable_mosaic.version = 11 : i64} {
  func.func @mlp_kernel(%arg0: i32, %arg1: memref<8x784xf32, #tpu.memory_space<vmem>>, %arg2: memref<784x32xf32, #tpu.memory_space<vmem>>, %arg3: memref<1x32xf32, #tpu.memory_space<vmem>>, %arg4: memref<32x32xf32, #tpu.memory_space<vmem>>, %arg5: memref<1x32xf32, #tpu.memory_space<vmem>>, %arg6: memref<32x32xf32, #tpu.memory_space<vmem>>, %arg7: memref<1x32xf32, #tpu.memory_space<vmem>>, %arg8: memref<32x10xf32, #tpu.memory_space<vmem>>, %arg9: memref<1x10xf32, #tpu.memory_space<vmem>>, %arg10: memref<8x10xf32, #tpu.memory_space<vmem>>) attributes {dimension_semantics = [#tpu.dimension_semantics<parallel>], iteration_bounds = array<i64: 1>, scalar_prefetch = 0 : i64, scratch_operands = 0 : i64, tpu.core_type = #tpu.core_type<tc>, window_params = [{transform_indices = @transform_0, window_bounds = array<i64: 8, 784>}, {pipeline_mode = #tpu.pipeline_mode<synchronous>, transform_indices = @transform_1, window_bounds = array<i64: 784, 32>}, {pipeline_mode = #tpu.pipeline_mode<synchronous>, transform_indices = @transform_2, window_bounds = array<i64: 1, 32>}, {pipeline_mode = #tpu.pipeline_mode<synchronous>, transform_indices = @transform_3, window_bounds = array<i64: 32, 32>}, {pipeline_mode = #tpu.pipeline_mode<synchronous>, transform_indices = @transform_4, window_bounds = array<i64: 1, 32>}, {pipeline_mode = #tpu.pipeline_mode<synchronous>, transform_indices = @transform_5, window_bounds = array<i64: 32, 32>}, {pipeline_mode = #tpu.pipeline_mode<synchronous>, transform_indices = @transform_6, window_bounds = array<i64: 1, 32>}, {pipeline_mode = #tpu.pipeline_mode<synchronous>, transform_indices = @transform_7, window_bounds = array<i64: 32, 10>}, {pipeline_mode = #tpu.pipeline_mode<synchronous>, transform_indices = @transform_8, window_bounds = array<i64: 1, 10>}, {transform_indices = @transform_9, window_bounds = array<i64: 8, 10>}]} {
    %c0 = arith.constant 0 : index
    %c0_0 = arith.constant 0 : index
    %0 = vector.load %arg1[%c0, %c0_0] : memref<8x784xf32, #tpu.memory_space<vmem>>, vector<8x784xf32>
    %c0_1 = arith.constant 0 : index
    %c0_2 = arith.constant 0 : index
    %1 = vector.load %arg2[%c0_1, %c0_2] : memref<784x32xf32, #tpu.memory_space<vmem>>, vector<784x32xf32>
    %cst = arith.constant dense<0.000000e+00> : vector<8x32xf32>
    %2 = tpu.matmul %0, %1, %cst {dimension_numbers = #tpu.dot_dimension_numbers<[1], [0], [0], [1], [0, 0, 1, 1], [], []>} : vector<8x784xf32>, vector<784x32xf32>, vector<8x32xf32> -> vector<8x32xf32>
    %c0_3 = arith.constant 0 : index
    %c0_4 = arith.constant 0 : index
    %3 = vector.load %arg3[%c0_3, %c0_4] : memref<1x32xf32, #tpu.memory_space<vmem>>, vector<1x32xf32>
    %4 = vector.broadcast %3 : vector<1x32xf32> to vector<8x32xf32>
    %5 = arith.addf %2, %4 : vector<8x32xf32>
    %cst_5 = arith.constant 0.000000e+00 : f32
    %6 = vector.broadcast %cst_5 : f32 to vector<8x32xf32>
    %7 = arith.cmpf ogt, %5, %6 : vector<8x32xf32>
    %cst_6 = arith.constant 0.00999999977 : f32
    %8 = vector.broadcast %cst_6 : f32 to vector<8x32xf32>
    %9 = arith.mulf %8, %5 : vector<8x32xf32>
    %10 = arith.select %7, %5, %9 : vector<8x32xi1>, vector<8x32xf32>
    %c0_7 = arith.constant 0 : index
    %c0_8 = arith.constant 0 : index
    %11 = vector.load %arg4[%c0_7, %c0_8] : memref<32x32xf32, #tpu.memory_space<vmem>>, vector<32x32xf32>
    %cst_9 = arith.constant dense<0.000000e+00> : vector<8x32xf32>
    %12 = tpu.matmul %10, %11, %cst_9 {dimension_numbers = #tpu.dot_dimension_numbers<[1], [0], [0], [1], [0, 0, 1, 1], [], []>} : vector<8x32xf32>, vector<32x32xf32>, vector<8x32xf32> -> vector<8x32xf32>
    %c0_10 = arith.constant 0 : index
    %c0_11 = arith.constant 0 : index
    %13 = vector.load %arg5[%c0_10, %c0_11] : memref<1x32xf32, #tpu.memory_space<vmem>>, vector<1x32xf32>
    %14 = vector.broadcast %13 : vector<1x32xf32> to vector<8x32xf32>
    %15 = arith.addf %12, %14 : vector<8x32xf32>
    %cst_12 = arith.constant 0.000000e+00 : f32
    %16 = vector.broadcast %cst_12 : f32 to vector<8x32xf32>
    %17 = arith.maximumf %15, %16 : vector<8x32xf32>
    %c0_13 = arith.constant 0 : index
    %c0_14 = arith.constant 0 : index
    %18 = vector.load %arg6[%c0_13, %c0_14] : memref<32x32xf32, #tpu.memory_space<vmem>>, vector<32x32xf32>
    %cst_15 = arith.constant dense<0.000000e+00> : vector<8x32xf32>
    %19 = tpu.matmul %17, %18, %cst_15 {dimension_numbers = #tpu.dot_dimension_numbers<[1], [0], [0], [1], [0, 0, 1, 1], [], []>} : vector<8x32xf32>, vector<32x32xf32>, vector<8x32xf32> -> vector<8x32xf32>
    %c0_16 = arith.constant 0 : index
    %c0_17 = arith.constant 0 : index
    %20 = vector.load %arg7[%c0_16, %c0_17] : memref<1x32xf32, #tpu.memory_space<vmem>>, vector<1x32xf32>
    %21 = vector.broadcast %20 : vector<1x32xf32> to vector<8x32xf32>
    %22 = arith.addf %19, %21 : vector<8x32xf32>
    %23 = math.tanh %22 : vector<8x32xf32>
    %c0_18 = arith.constant 0 : index
    %c0_19 = arith.constant 0 : index
    %24 = vector.load %arg8[%c0_18, %c0_19] : memref<32x10xf32, #tpu.memory_space<vmem>>, vector<32x10xf32>
    %cst_20 = arith.constant dense<0.000000e+00> : vector<8x10xf32>
    %25 = tpu.matmul %23, %24, %cst_20 {dimension_numbers = #tpu.dot_dimension_numbers<[1], [0], [0], [1], [0, 0, 1, 1], [], []>} : vector<8x32xf32>, vector<32x10xf32>, vector<8x10xf32> -> vector<8x10xf32>
    %c0_21 = arith.constant 0 : index
    %c0_22 = arith.constant 0 : index
    %26 = vector.load %arg9[%c0_21, %c0_22] : memref<1x10xf32, #tpu.memory_space<vmem>>, vector<1x10xf32>
    %27 = vector.broadcast %26 : vector<1x10xf32> to vector<8x10xf32>
    %28 = arith.addf %25, %27 : vector<8x10xf32>
    %c0_23 = arith.constant 0 : index
    %c0_24 = arith.constant 0 : index
    %29 = vector.load %arg10[%c0_23, %c0_24] : memref<8x10xf32, #tpu.memory_space<vmem>>, vector<8x10xf32>
    tpu.vector_store %arg10[%c0_23, %c0_24], %28 {strides = array<i32>} : memref<8x10xf32, #tpu.memory_space<vmem>>, vector<8x10xf32>,
    return
  }
  func.func @transform_0(%arg0: i32) -> (i32, i32) {
    %c0_i32 = arith.constant 0 : i32
    %c0_i32_0 = arith.constant 0 : i32
    return %arg0, %c0_i32 : i32, i32
  }
  func.func @transform_1(%arg0: i32) -> (i32, i32) {
    %c0_i32 = arith.constant 0 : i32
    %c0_i32_0 = arith.constant 0 : i32
    %c0_i32_1 = arith.constant 0 : i32
    return %c0_i32, %c0_i32_0 : i32, i32
  }
  func.func @transform_2(%arg0: i32) -> (i32, i32) {
    %c0_i32 = arith.constant 0 : i32
    %c0_i32_0 = arith.constant 0 : i32
    %c0_i32_1 = arith.constant 0 : i32
    return %c0_i32, %c0_i32_0 : i32, i32
  }
  func.func @transform_3(%arg0: i32) -> (i32, i32) {
    %c0_i32 = arith.constant 0 : i32
    %c0_i32_0 = arith.constant 0 : i32
    %c0_i32_1 = arith.constant 0 : i32
    return %c0_i32, %c0_i32_0 : i32, i32
  }
  func.func @transform_4(%arg0: i32) -> (i32, i32) {
    %c0_i32 = arith.constant 0 : i32
    %c0_i32_0 = arith.constant 0 : i32
    %c0_i32_1 = arith.constant 0 : i32
    return %c0_i32, %c0_i32_0 : i32, i32
  }
  func.func @transform_5(%arg0: i32) -> (i32, i32) {
    %c0_i32 = arith.constant 0 : i32
    %c0_i32_0 = arith.constant 0 : i32
    %c0_i32_1 = arith.constant 0 : i32
    return %c0_i32, %c0_i32_0 : i32, i32
  }
  func.func @transform_6(%arg0: i32) -> (i32, i32) {
    %c0_i32 = arith.constant 0 : i32
    %c0_i32_0 = arith.constant 0 : i32
    %c0_i32_1 = arith.constant 0 : i32
    return %c0_i32, %c0_i32_0 : i32, i32
  }
  func.func @transform_7(%arg0: i32) -> (i32, i32) {
    %c0_i32 = arith.constant 0 : i32
    %c0_i32_0 = arith.constant 0 : i32
    %c0_i32_1 = arith.constant 0 : i32
    return %c0_i32, %c0_i32_0 : i32, i32
  }
  func.func @transform_8(%arg0: i32) -> (i32, i32) {
    %c0_i32 = arith.constant 0 : i32
    %c0_i32_0 = arith.constant 0 : i32
    %c0_i32_1 = arith.constant 0 : i32
    return %c0_i32, %c0_i32_0 : i32, i32
  }
  func.func @transform_9(%arg0: i32) -> (i32, i32) {
    %c0_i32 = arith.constant 0 : i32
    %c0_i32_0 = arith.constant 0 : i32
    return %arg0, %c0_i32 : i32, i32
  }
}

</mosaic_0001>

<bundles_post_ra>
// kernel: mlp_forward.1
= control target key start
LH: loop header
LB: loop body
LE: loop exit
PB: predicated region body
PF: predicated region fallthrough
CT: control target
= control target key end

     0   :  { %s1468_s0 = inlined_call_operand.vmem [shape: f32[8,784], index: 0, kind: input, shape index: {}]   ;;  %s1469_s1 = inlined_call_operand.vmem [shape: f32[784,32], index: 1, kind: input, shape index: {}]   ;;  %s1470_s2 = inlined_call_operand.vmem [shape: f32[1,32], index: 2, kind: input, shape index: {}]   ;;  %s1471_s3 = inlined_call_operand.vmem [shape: f32[32,32], index: 3, kind: input, shape index: {}]   ;;  %s1472_s4 = inlined_call_operand.vmem [shape: f32[1,32], index: 4, kind: input, shape index: {}]   ;;  %s1473_s5 = inlined_call_operand.vmem [shape: f32[32,32], index: 5, kind: input, shape index: {}]   ;;  %s1474_s6 = inlined_call_operand.vmem [shape: f32[1,32], index: 6, kind: input, shape index: {}]   ;;  %s1475_s7 = inlined_call_operand.vmem [shape: f32[32,10], index: 7, kind: input, shape index: {}]   ;;  %s1476_s8 = inlined_call_operand.vmem [shape: f32[1,10], index: 8, kind: input, shape index: {}]   ;;  %s1477_s9 = inlined_call_operand.hbm [shape: f32[8,10], index: 9, kind: output, shape index: {}]  }
   0x1   :  { %v56_v0 = vld [vmem:[%s1469_s1 + $0x80] sm:$0xff]  ;;  %v57_v1 = vld [vmem:[%s1469_s1 + $0x88] sm:$0xff]  ;;  %v58_v11 = vld [vmem:[%s1469_s1 + $0x90] sm:$0xff] }
   0x2   :  { %v40_v2 = vld [vmem:[%s1469_s1] sm:$0xff]  ;;  %v874_v3 = vpack.c.bf16 %v57_v1, %v56_v0  ;;  %v41_v4 = vld [vmem:[%s1469_s1 + $0x8] sm:$0xff]  ;;  %v59_v13 = vld [vmem:[%s1469_s1 + $0x98] sm:$0xff] }
   0x3   :  { %v88_v5 = vld [vmem:[%s1469_s1 + $0x180] sm:$0xff]  ;;  %v89_v6 = vld [vmem:[%s1469_s1 + $0x188] sm:$0xff]  ;;  %v876_v7 = vpack.c.bf16 %v41_v4, %v40_v2  ;;  %v42_v14 = vld [vmem:[%s1469_s1 + $0x10] sm:$0xff]  ;;  %v878_v16 = vpack.c.bf16 %v59_v13, %v58_v11 }
   0x4   :  { %v906_v8 = vpack.c.bf16 %v89_v6, %v88_v5  ;;  %v72_v9 = vld [vmem:[%s1469_s1 + $0x100] sm:$0xff]  ;;  %v73_v10 = vld [vmem:[%s1469_s1 + $0x108] sm:$0xff]  ;;  %875 = vmatprep.subr.bf16.mxu0 %v874_v3  ;;  %v43_v15 = vld [vmem:[%s1469_s1 + $0x18] sm:$0xff] }
   0x5   :  { %v908_v12 = vpack.c.bf16 %v73_v10, %v72_v9  ;;  %877 = vmatpush3.bf16.msra.mxu0 %v876_v7  ;;  %v880_v17 = vpack.c.bf16 %v43_v15, %v42_v14  ;;  %v90_v18 = vld [vmem:[%s1469_s1 + $0x190] sm:$0xff]  ;;  %v91_v19 = vld [vmem:[%s1469_s1 + $0x198] sm:$0xff]  ;;  %v60_v23 = vld [vmem:[%s1469_s1 + $0xa0] sm:$0xff] }
   0x6   :  { %907 = vmatprep.subr.bf16.mxu1 %v906_v8  ;;  %v74_v20 = vld [vmem:[%s1469_s1 + $0x110] sm:$0xff]  ;;  %v910_v21 = vpack.c.bf16 %v91_v19, %v90_v18  ;;  %v75_v22 = vld [vmem:[%s1469_s1 + $0x118] sm:$0xff]  ;;  %v61_v24 = vld [vmem:[%s1469_s1 + $0xa8] sm:$0xff]  ;;  %879 = vmatprep.subr.bf16.mxu0 %v878_v16 }
   0x7   :  { %909 = vmatpush3.bf16.msra.mxu1 %v908_v12  ;;  %v912_v25 = vpack.c.bf16 %v75_v22, %v74_v20  ;;  %v882_v26 = vpack.c.bf16 %v61_v24, %v60_v23  ;;  %v44_v27 = vld [vmem:[%s1469_s1 + $0x20] sm:$0xff]  ;;  %v45_v28 = vld [vmem:[%s1469_s1 + $0x28] sm:$0xff]  ;;  %v62_v35 = vld [vmem:[%s1469_s1 + $0xb0] sm:$0xff] }
   0x8   :  { %v92_v29 = vld [vmem:[%s1469_s1 + $0x1a0] sm:$0xff]  ;;  %911 = vmatprep.subr.bf16.mxu1 %v910_v21  ;;  %v93_v30 = vld [vmem:[%s1469_s1 + $0x1a8] sm:$0xff]  ;;  %v884_v33 = vpack.c.bf16 %v45_v28, %v44_v27  ;;  %v63_v36 = vld [vmem:[%s1469_s1 + $0xb8] sm:$0xff] }
   0x9   :  { %v76_v31 = vld [vmem:[%s1469_s1 + $0x120] sm:$0xff]  ;;  %v77_v32 = vld [vmem:[%s1469_s1 + $0x128] sm:$0xff]  ;;  %881 = vmatpush3.bf16.msra.mxu0 %v880_v17  ;;  %v914_v34 = vpack.c.bf16 %v93_v30, %v92_v29  ;;  %v46_v37 = vld [vmem:[%s1469_s1 + $0x30] sm:$0xff]  ;;  %v886_v39 = vpack.c.bf16 %v63_v36, %v62_v35 }
   0xa   :  { %883 = vmatprep.subr.bf16.mxu0 %v882_v26  ;;  %v916_v38 = vpack.c.bf16 %v77_v32, %v76_v31  ;;  %v47_v40 = vld [vmem:[%s1469_s1 + $0x38] sm:$0xff]  ;;  %v94_v41 = vld [vmem:[%s1469_s1 + $0x1b0] sm:$0xff]  ;;  %v64_v46 = vld [vmem:[%s1469_s1 + $0xc0] sm:$0xff] }
   0xb   :  { %913 = vmatpush3.bf16.msra.mxu1 %v912_v25  ;;  %v95_v42 = vld [vmem:[%s1469_s1 + $0x1b8] sm:$0xff]  ;;  %v78_v44 = vld [vmem:[%s1469_s1 + $0x130] sm:$0xff]  ;;  %v65_v47 = vld [vmem:[%s1469_s1 + $0xc8] sm:$0xff]  ;;  %v888_v48 = vpack.c.bf16 %v47_v40, %v46_v37 }
   0xc   :  { %915 = vmatprep.subr.bf16.mxu1 %v914_v34  ;;  %v918_v43 = vpack.c.bf16 %v95_v42, %v94_v41  ;;  %v79_v45 = vld [vmem:[%s1469_s1 + $0x138] sm:$0xff]  ;;  %v96_v49 = vld [vmem:[%s1469_s1 + $0x1c0] sm:$0xff]  ;;  %v97_v50 = vld [vmem:[%s1469_s1 + $0x1c8] sm:$0xff]  ;;  %v890_v52 = vpack.c.bf16 %v65_v47, %v64_v46 }
   0xd   :  { %885 = vmatpush3.bf16.msra.mxu0 %v884_v33  ;;  %v920_v51 = vpack.c.bf16 %v79_v45, %v78_v44  ;;  %v48_v53 = vld [vmem:[%s1469_s1 + $0x40] sm:$0xff]  ;;  %v49_v54 = vld [vmem:[%s1469_s1 + $0x48] sm:$0xff]  ;;  %v922_v56 = vpack.c.bf16 %v97_v50, %v96_v49  ;;  %v66_v58 = vld [vmem:[%s1469_s1 + $0xd0] sm:$0xff]  ;;  %v1021_v50 = vmov 0.0|0.0  }
   0xe   :  { %887 = vmatprep.subr.bf16.mxu0 %v886_v39  ;;  %v80_v55 = vld [vmem:[%s1469_s1 + $0x140] sm:$0xff]  ;;  %v81_v57 = vld [vmem:[%s1469_s1 + $0x148] sm:$0xff]  ;;  %v67_v59 = vld [vmem:[%s1469_s1 + $0xd8] sm:$0xff]  ;;  %v892_v62 = vpack.c.bf16 %v49_v54, %v48_v53 }
   0xf   :  { %917 = vmatpush3.bf16.msra.mxu1 %v916_v38  ;;  %v98_v60 = vld [vmem:[%s1469_s1 + $0x1d0] sm:$0xff]  ;;  %v99_v61 = vld [vmem:[%s1469_s1 + $0x1d8] sm:$0xff]  ;;  %v924_v63 = vpack.c.bf16 %v81_v57, %v80_v55  ;;  %v894_v0 = vpack.c.bf16 %v67_v59, %v66_v58  ;;  %v68_v6 = vld [vmem:[%s1469_s1 + $0xe0] sm:$0xff] }
  0x10   :  { %919 = vmatprep.subr.bf16.mxu1 %v918_v43  ;;  %v50_v1 = vld [vmem:[%s1469_s1 + $0x50] sm:$0xff]  ;;  %v51_v2 = vld [vmem:[%s1469_s1 + $0x58] sm:$0xff]  ;;  %v926_v4 = vpack.c.bf16 %v99_v61, %v98_v60  ;;  %v69_v7 = vld [vmem:[%s1469_s1 + $0xe8] sm:$0xff] }
  0x11   :  { %889 = vmatpush3.bf16.msra.mxu0 %v888_v48  ;;  %v82_v3 = vld [vmem:[%s1469_s1 + $0x150] sm:$0xff]  ;;  %v83_v5 = vld [vmem:[%s1469_s1 + $0x158] sm:$0xff]  ;;  %v100_v8 = vld [vmem:[%s1469_s1 + $0x1e0] sm:$0xff]  ;;  %v896_v10 = vpack.c.bf16 %v51_v2, %v50_v1  ;;  %v898_v14 = vpack.c.bf16 %v69_v7, %v68_v6 }
  0x12   :  { %891 = vmatprep.subr.bf16.mxu0 %v890_v52  ;;  %v101_v9 = vld [vmem:[%s1469_s1 + $0x1e8] sm:$0xff]  ;;  %v52_v11 = vld [vmem:[%s1469_s1 + $0x60] sm:$0xff]  ;;  %v928_v13 = vpack.c.bf16 %v83_v5, %v82_v3  ;;  %v70_v19 = vld [vmem:[%s1469_s1 + $0xf0] sm:$0xff] }
  0x13   :  { %921 = vmatpush3.bf16.msra.mxu1 %v920_v51  ;;  %v34_v12 = vld [vmem:[%s1468_s0 + $0x8] sm:$0xff]  ;;  %v84_v16 = vld [vmem:[%s1469_s1 + $0x160] sm:$0xff]  ;;  %v930_v18 = vpack.c.bf16 %v101_v9, %v100_v8  ;;  %v71_v20 = vld [vmem:[%s1469_s1 + $0xf8] sm:$0xff] }
  0x14   :  { %923 = vmatprep.subr.bf16.mxu1 %v922_v56  ;;  %v53_v15 = vld [vmem:[%s1469_s1 + $0x68] sm:$0xff]  ;;  %213 = vmatprep.mubr.f32.mxu0 %v34_v12  ;;  %v36_v21 = vld [vmem:[%s1468_s0 + $0x18] sm:$0xff]  ;;  %v102_v22 = vld [vmem:[%s1469_s1 + $0x1f0] sm:$0xff]  ;;  %v902_v26 = vpack.c.bf16 %v71_v20, %v70_v19 }
  0x15   :  { %893 = vmatpush3.bf16.msra.mxu0 %v892_v62  ;;  %v85_v17 = vld [vmem:[%s1469_s1 + $0x168] sm:$0xff]  ;;  %v103_v23 = vld [vmem:[%s1469_s1 + $0x1f8] sm:$0xff]  ;;  %283 = vmatprep.mubr.f32.mxu1 %v36_v21  ;;  %v900_v24 = vpack.c.bf16 %v53_v15, %v52_v11  ;;  %v54_v27 = vld [vmem:[%s1469_s1 + $0x70] sm:$0xff] }
  0x16   :  { %895 = vmatprep.subr.bf16.mxu0 %v894_v0  ;;  %v932_v25 = vpack.c.bf16 %v85_v17, %v84_v16  ;;  %v55_v28 = vld [vmem:[%s1469_s1 + $0x78] sm:$0xff]  ;;  %v86_v29 = vld [vmem:[%s1469_s1 + $0x170] sm:$0xff]  ;;  %v934_v30 = vpack.c.bf16 %v103_v23, %v102_v22  ;;  %v120_v32 = vld [vmem:[%s1469_s1 + $0x280] sm:$0xff] }
  0x17   :  { %925 = vmatpush3.bf16.msra.mxu1 %v924_v63  ;;  %v87_v31 = vld [vmem:[%s1469_s1 + $0x178] sm:$0xff]  ;;  %v121_v33 = vld [vmem:[%s1469_s1 + $0x288] sm:$0xff]  ;;  %v904_v34 = vpack.c.bf16 %v55_v28, %v54_v27  ;;  %v104_v37 = vld [vmem:[%s1469_s1 + $0x200] sm:$0xff] }
  0x18   :  { %927 = vmatprep.subr.bf16.mxu1 %v926_v4  ;;  %v936_v35 = vpack.c.bf16 %v87_v31, %v86_v29  ;;  %v938_v36 = vpack.c.bf16 %v121_v33, %v120_v32  ;;  %v105_v38 = vld [vmem:[%s1469_s1 + $0x208] sm:$0xff]  ;;  %v122_v39 = vld [vmem:[%s1469_s1 + $0x290] sm:$0xff]  ;;  %v123_v40 = vld [vmem:[%s1469_s1 + $0x298] sm:$0xff] }
  0x19   :  { %897 = vmatpush3.bf16.msra.mxu0 %v896_v10  ;;  %v33_v41 = vld [vmem:[%s1468_s0] sm:$0xff]  ;;  %v940_v42 = vpack.c.bf16 %v105_v38, %v104_v37  ;;  %v35_v43 = vld [vmem:[%s1468_s0 + $0x10] sm:$0xff]  ;;  %v942_v45 = vpack.c.bf16 %v123_v40, %v122_v39  ;;  %v107_v46 = vld [vmem:[%s1469_s1 + $0x218] sm:$0xff] }
  0x1a   :  { %899 = vmatprep.subr.bf16.mxu0 %v898_v14  ;;  %v106_v44 = vld [vmem:[%s1469_s1 + $0x210] sm:$0xff]  ;;  %v124_v47 = vld [vmem:[%s1469_s1 + $0x2a0] sm:$0xff]  ;;  %v125_v48 = vld [vmem:[%s1469_s1 + $0x2a8] sm:$0xff] }
  0x1b   :  { %929 = vmatpush3.bf16.msra.mxu1 %v928_v13  ;;  %v38_v49 = vld [vmem:[%s1468_s0 + $0x28] sm:$0xff]  ;;  %v136_v51 = vld [vmem:[%s1469_s1 + $0x300] sm:$0xff] }
  0x1c   :  { %931 = vmatprep.subr.bf16.mxu1 %v930_v18  ;;  %v137_v52 = vld [vmem:[%s1469_s1 + $0x308] sm:$0xff] }
  0x1d   :  { %901 = vmatpush3.bf16.msra.mxu0 %v900_v24  ;;  %v971_v53 = vpack.c.bf16 %v137_v52, %v136_v51 }
  0x1e   :  { %903 = vmatprep.subr.bf16.mxu0 %v902_v26 }
  0x1f   :  { %933 = vmatpush3.bf16.msra.mxu1 %v932_v25 }
  0x20   :  { %935 = vmatprep.subr.bf16.mxu1 %v934_v30 }
  0x21   :  { %905 = vmatpush3.bf16.msra.mxu0 %v904_v34 }
  0x22   :  { %939 = vmatprep.subr.bf16.mxu0 %v938_v36 }
  0x23   :  { %937 = vmatpush3.bf16.msra.mxu1 %v936_v35 }
  0x24   :  { %970 = vmatprep.subr.bf16.mxu1 %v1021_v50  ;;  %214 = vmatmul.mubr.f32.vlgmr.msra.gmra.mrb[0].mxu0 %v33_v41 }
  0x25   :  { %14 = vsyncpa [#allocation3], 0  ;;  %941 = vmatpush3.bf16.msra.mxu0 %v940_v42  ;;  %v944_v54 = vpack.c.bf16 %v107_v46, %v106_v44  ;;  %v946_v55 = vpack.c.bf16 %v125_v48, %v124_v47  ;;  %v108_v56 = vld [vmem:[%s1469_s1 + $0x220] sm:$0xff]  ;;  %v109_v57 = vld [vmem:[%s1469_s1 + $0x228] sm:$0xff]  ;;  %353 = vmatprep.mubr.f32.mxu0 %v38_v49  ;;  %vm1022_vm0 = vmmov 0   ;;  %v1023_v60 = vmov 0.0  }
  0x26   :  { %284 = vmatmul.mubr.f32.vlgmr.msra.gmra.mrb[0].mxu1 %v35_v43  ;;  %943 = vmatprep.subr.bf16.mxu0 %v942_v45  ;;  %v126_v58 = vld [vmem:[%s1469_s1 + $0x2b0] sm:$0xff]  ;;  %v127_v59 = vld [vmem:[%s1469_s1 + $0x2b8] sm:$0xff]  ;;  %vm145_vm1 = vcmask 130048   ;;  %v948_v62 = vpack.c.bf16 %v109_v57, %v108_v56  ;;  %v128_v2 = vld [vmem:[%s1469_s1 + $0x2c0] sm:$0xff]  ;;  %vm443_vm3 = vcmask 261120   ;;  %vm687_vm4 = vcmask 80896  }
  0x27   :  { %972 = vmatpush3.bf16.msra.mxu1 %v971_v53  ;;  %838 = vmatprep.mubr.msk.f32.mxu1 %vm1022_vm0, %v1023_v60  ;;  %v39_v61 = vld [vmem:[%s1468_s0 + $0x30] sm:$0xff]  ;;  %v950_v63 = vpack.c.bf16 %v127_v59, %v126_v58  ;;  %v111_v1 = vld [vmem:[%s1469_s1 + $0x238] sm:$0xff]  ;;  %v129_v3 = vld [vmem:[%s1469_s1 + $0x2c8] sm:$0xff] }
  0x28   :  { %973 = vmatprep.subr.bf16.mxu1 %v1021_v50  ;;  %v110_v0 = vld [vmem:[%s1469_s1 + $0x230] sm:$0xff]  ;;  %v954_v5 = vpack.c.bf16 %v129_v3, %v128_v2  ;;  %v112_v6 = vld [vmem:[%s1469_s1 + $0x240] sm:$0xff]  ;;  %v113_v7 = vld [vmem:[%s1469_s1 + $0x248] sm:$0xff] }
  0x29   :  { %945 = vmatpush3.bf16.msra.mxu0 %v944_v54  ;;  %v952_v4 = vpack.c.bf16 %v111_v1, %v110_v0  ;;  %v130_v8 = vld [vmem:[%s1469_s1 + $0x2d0] sm:$0xff]  ;;  %v131_v9 = vld [vmem:[%s1469_s1 + $0x2d8] sm:$0xff]  ;;  %v956_v10 = vpack.c.bf16 %v113_v7, %v112_v6  ;;  %v132_v14 = vld [vmem:[%s1469_s1 + $0x2e0] sm:$0xff] }
  0x2a   :  { %947 = vmatprep.subr.bf16.mxu0 %v946_v55  ;;  %839 = vmatmul.mubr.msk.f32.vlgmr.msra.gmra.mrb[2].mxu1 %vm145_vm1, %v39_v61  ;;  %v958_v11 = vpack.c.bf16 %v131_v9, %v130_v8  ;;  %v114_v12 = vld [vmem:[%s1469_s1 + $0x250] sm:$0xff]  ;;  %v115_v13 = vld [vmem:[%s1469_s1 + $0x258] sm:$0xff]  ;;  %v133_v15 = vld [vmem:[%s1469_s1 + $0x2e8] sm:$0xff] }
  0x2b   :  { %849 = vmatprep.mubr.msk.f32.mxu1 %vm1022_vm0, %v1023_v60  ;;  %v960_v16 = vpack.c.bf16 %v115_v13, %v114_v12  ;;  %v962_v17 = vpack.c.bf16 %v133_v15, %v132_v14  ;;  %v116_v18 = vld [vmem:[%s1469_s1 + $0x260] sm:$0xff]  ;;  %v117_v19 = vld [vmem:[%s1469_s1 + $0x268] sm:$0xff]  ;;  %v134_v20 = vld [vmem:[%s1469_s1 + $0x2f0] sm:$0xff] }
  0x2c   :  { %v135_v21 = vld [vmem:[%s1469_s1 + $0x2f8] sm:$0xff]  ;;  %v964_v22 = vpack.c.bf16 %v117_v19, %v116_v18  ;;  %v118_v24 = vld [vmem:[%s1469_s1 + $0x270] sm:$0xff]  ;;  %v37_v27 = vld [vmem:[%s1468_s0 + $0x20] sm:$0xff] }
  0x2d   :  { %949 = vmatpush3.bf16.msra.mxu0 %v948_v62  ;;  %v966_v23 = vpack.c.bf16 %v135_v21, %v134_v20  ;;  %v119_v25 = vld [vmem:[%s1469_s1 + $0x278] sm:$0xff]  ;;  %v432_v28 = vld [vmem:[%s1471_s3] sm:$0xff]  ;;  %v433_v29 = vld [vmem:[%s1471_s3 + $0x8] sm:$0xff] }
  0x2e   :  { %951 = vmatprep.subr.bf16.mxu0 %v950_v63  ;;  %v968_v26 = vpack.c.bf16 %v119_v25, %v118_v24  ;;  %v974_v30 = vpack.c.bf16 %v433_v29, %v432_v28  ;;  %v434_v31 = vld [vmem:[%s1471_s3 + $0x10] sm:$0xff]  ;;  %v435_v32 = vld [vmem:[%s1471_s3 + $0x18] sm:$0xff]  ;;  %v703_v35 = vld [vmem:[%s1470_s2] ss:$0 sm:$0xff] }
  0x2f   :  { %v977_v33 = vpack.c.bf16 %v435_v32, %v434_v31  ;;  %v518_v49 = vld [vmem:[%s1473_s5] sm:$0xff]  ;;  %v519_v51 = vld [vmem:[%s1473_s5 + $0x8] sm:$0xff]  ;;  %v520_v56 = vld [vmem:[%s1473_s5 + $0x10] sm:$0xff] }
  0x30   :  { %975 = vmatpush3.bf16.msra.mxu1 %v974_v30  ;;  %v980_v54 = vpack.c.bf16 %v519_v51, %v518_v49  ;;  %v521_v57 = vld [vmem:[%s1473_s5 + $0x18] sm:$0xff]  ;;  %v705_v59 = vld [vmem:[%s1472_s4] ss:$0 sm:$0xff]  ;;  %v604_v2 = vld [vmem:[%s1475_s7 + $0x8] sm:$0xff] }
  0x31   :  { %953 = vmatpush3.bf16.msra.mxu0 %v952_v4  ;;  %976 = vmatprep.subr.bf16.mxu1 %v1021_v50  ;;  %v983_v58 = vpack.c.bf16 %v521_v57, %v520_v56  ;;  %v603_v1 = vld [vmem:[%s1475_s7] sm:$0xff]  ;;  %v605_v3 = vld [vmem:[%s1475_s7 + $0x10] sm:$0xff] }
  0x32   :  { %955 = vmatprep.subr.bf16.mxu0 %v954_v5  ;;  %v986_v4 = vpack.c.bf16 %v604_v2, %v603_v1  ;;  %v606_v5 = vld [vmem:[%s1475_s7 + $0x18] sm:$0xff]  ;;  %s1024_s7 = smov [#allocation2]  }
  0x33   :  { %v989_v6 = vpack.c.bf16 %v606_v5, %v605_v3  ;;  %s695_s13 = sshll.u32 %s1024_s7, 4  ;;  %s696_s13 = int_to_ptr.vmem [resolvable:$true] %s695_s13 }
  0x34   :  { %978 = vmatpush3.bf16.msra.mxu1 %v977_v33  ;;  %p1002_p1 = scmp.lt.s32.totalorder %s696_s13, %s696_s13 }
  0x35   :  { %957 = vmatpush3.bf16.msra.mxu0 %v956_v10  ;;  %979 = vmatprep.subr.bf16.mxu1 %v1021_v50 }
  0x36   :  { %959 = vmatprep.subr.bf16.mxu0 %v958_v11  ;;  %v709_v11 = vld [vmem:[%s1476_s8] ss:$0 sm:$0xff] }
  0x39   :  { %961 = vmatpush3.bf16.msra.mxu0 %v960_v16 }
  0x3a   :  { %963 = vmatprep.subr.bf16.mxu0 %v962_v17 }
  0x3d   :  { %965 = vmatpush3.bf16.msra.mxu0 %v964_v22 }
  0x3e   :  { %967 = vmatprep.subr.bf16.mxu0 %v966_v23 }
  0x41   :  { %969 = vmatpush3.bf16.msra.mxu0 %v968_v26 }
  0x44   :  { %354 = vmatmul.mubr.f32.vlgmr.msra.gmra.mrb[2].mxu0 %v37_v27 }
  0xf7   :  { %v743_v34 = vpop.f32.mrb[0].mxu0 }
  0xf8   :  { %v744_v36 = vpop.f32.mrb[1].mxu0 }
  0xf9   :  { %v778_v37 = vpop.f32.mrb[0].mxu1  ;;  %v745_v38 = vadd.f32 %v744_v36, %v743_v34 }
  0xfa   :  { %v779_v39 = vpop.f32.mrb[1].mxu1 }
  0xfb   :  { %v780_v40 = vadd.f32 %v779_v39, %v778_v37  ;;  %v216_v41 = vadd.f32 %v745_v38, %v703_v35 }
  0xfd   :  { %v286_v42 = vadd.f32 %v780_v40, %v216_v41  ;;  %v425_v43 = vpop.f32.mrb[2].mxu1 }
  0xfe   :  { %v840_v44 = vpop.f32.mrb[3].mxu1 }
 0x117   :  { %v813_v45 = vpop.f32.mrb[2].mxu0 }
 0x118   :  { %v814_v46 = vpop.f32.mrb[3].mxu0 }
 0x119   :  { %v815_v47 = vadd.f32 %v814_v46, %v813_v45 }
 0x11b   :  { %v356_v48 = vadd.f32 %v815_v47, %v286_v42 }
 0x11d   :  { %v426_v52 = vadd.f32 %v425_v43, %v356_v48 }
 0x11f   :  { %vm429_vm2 = vcmp.gt.f32.partialorder %v426_v52, 0.0  ;;  %v430_v53 = vmul.f32 0.01, %v426_v52 }
 0x121   :  { %v431_v55 = vsel %vm429_vm2, %v426_v52, %v430_v53 }
 0x122   :  { %850 = vmatmul.mubr.msk.f32.vlgmr.msra.gmra.mrb[4].mxu1 %vm443_vm3, %v431_v55 }
 0x123   :  { %981 = vmatpush3.bf16.msra.mxu1 %v980_v54  ;;  %860 = vmatprep.mubr.msk.f32.mxu1 %vm1022_vm0, %v1023_v60 }
 0x124   :  { %982 = vmatprep.subr.bf16.mxu1 %v1021_v50 }
 0x127   :  { %984 = vmatpush3.bf16.msra.mxu1 %v983_v58 }
 0x128   :  { %985 = vmatprep.subr.bf16.mxu1 %v1021_v50 }
 0x1f5   :  { %v513_v61 = vpop.f32.mrb[4].mxu1 }
 0x1f6   :  { %v514_v62 = vadd.f32 %v705_v59, %v513_v61  ;;  %v851_v63 = vpop.f32.mrb[5].mxu1 }
 0x1f8   :  { %v517_v0 = vmax.f32 %v514_v62, 0.0 }
 0x1fa   :  { %861 = vmatmul.mubr.msk.f32.vlgmr.msra.gmra.mrb[6].mxu1 %vm443_vm3, %v517_v0 }
 0x1fb   :  { %871 = vmatprep.mubr.msk.f32.mxu1 %vm1022_vm0, %v1023_v60  ;;  %987 = vmatpush3.bf16.msra.mxu1 %v986_v4  ;;  %v707_v60 = vld [vmem:[%s1474_s6] ss:$0 sm:$0xff]  ;;  %s997_s6 = scalar_lea.vmem %s696_s13, 128 }
 0x1fc   :  { %988 = vmatprep.subr.bf16.mxu1 %v1021_v50  ;;  %p998_p0 = scmp.ne.s32.totalorder %s696_s13, %s997_s6  ;;  %p1003_p2 = scmp.lt.s32.totalorder %s997_s6, %s997_s6 }
 0x1fe   :  { %p1004_p3 = por %p1003_p2, %p1002_p1 }
 0x1ff   :  { %990 = vmatpush3.bf16.msra.mxu1 %v989_v6 }
 0x200   :  { %p1005_p4 = pnand %p1004_p3, %p998_p0 }
 0x2cd   :  { %v598_v7 = vpop.f32.mrb[6].mxu1 }
 0x2ce   :  { %v599_v8 = vadd.f32 %v707_v60, %v598_v7  ;;  %v862_v9 = vpop.f32.mrb[7].mxu1 }
 0x2d0   :  { %995 = vtanh.f32 %v599_v8 }
 0x2da   :  { %v996_v10 = vpop.eup %995 }
 0x2db   :  { %872 = vmatmul.mubr.msk.f32.vlgmr.msra.gmra.mrb[8].mxu1 %vm443_vm3, %v996_v10 }
 0x3ae   :  { %v683_v12 = vpop.f32.mrb[8].mxu1 }
 0x3af   :  { %v684_v50 = vadd.f32 %v709_v11, %v683_v12  ;;  %v873_v13 = vpop.f32.mrb[9].mxu1 }
 0x3b1   :  { %688 = vst.msk [vmem:[#allocation2] sm:$0xff] %vm687_vm4, %v684_v50 }
 0x3b2   :  { %1008 = shalt.err (!%p1005_p4)
}
 0x3b3   :  { %s1009_s0 = scalar_lea.hbm %s1477_s9, 128 }
 0x3b4   :  { %p1010_p5 = scmp.ne.s32.totalorder %s1477_s9, %s1009_s0  ;;  %p1013_p6 = scmp.lt.u32.totalorder %s1009_s0, %s1477_s9 }
 0x3b6   :  { %p1015_p7 = pnand %p1013_p6, %p1010_p5 }
 0x3b8   :  { %1018 = shalt.err (!%p1015_p7)
}
 0x3b9   :  { %698 = dma.vmem_to_hbm [thread:$0]  %s696_s13, 128, %s1477_s9, [#allocation3]  }
 0x3ba   :  { %1019 = dma.done.wait [#allocation3], 128  }
 0x3bb   :  { %1020 = vsyncadd [#allocation3], 4294967168 }
 0x3bc   :  { %702 = vsyncpa [#allocation3], 1 }

</bundles_post_ra>
